<compile_context>
chip_gen: v5e
topology: v5e:2x2
jax: 0.10.0
libtpu: 0.0.40
codegen_flags: <defaults>
</compile_context>

<pallas_src>
import jax
import jax.numpy as jnp
from jax.experimental import pallas as pl
from jax.experimental.pallas import tpu as pltpu


# ----------------------------- Pallas kernel -----------------------------

def _aconc_kernel(x_ref, prm_ref, o_ref):
    # x_ref  : (TN, TL)  rows = (batch, channel) pairs, lanes = spatial positions
    # prm_ref: (TN, 3)   columns = [p1 - p2, p2, beta] for the channel of each row
    # o_ref  : (TN, TL)
    x = x_ref[...].astype(jnp.float32)
    prm = prm_ref[...].astype(jnp.float32)
    scale = prm[:, 0:1]   # p1 - p2
    p2 = prm[:, 1:2]
    beta = prm[:, 2:3]

    dpx = scale * x
    out = dpx * jax.nn.sigmoid(beta * dpx) + p2 * x
    o_ref[...] = out.astype(o_ref.dtype)


# ----------------------------- wrapper -----------------------------

def _pick_tile(dim, target, align):
    # Full extent is always a legal block dim; otherwise use an aligned tile.
    if dim <= target:
        return dim
    return max(align, (target // align) * align)


def aconc_forward(x_nchw, p1, p2, beta, *, tile_n=256, tile_l=2048):
    """AconC forward.

    x_nchw      : (B, C, H, W)
    p1, p2, beta: per-channel parameters, shape (1, C, 1, 1) or (C,)
    """
    B, C, H, W = x_nchw.shape
    N, L = B * C, H * W

    p1 = jnp.reshape(p1, (C,)).astype(jnp.float32)
    p2 = jnp.reshape(p2, (C,)).astype(jnp.float32)
    beta = jnp.reshape(beta, (C,)).astype(jnp.float32)
    prm_c = jnp.stack([p1 - p2, p2, beta], axis=-1)   # (C, 3)
    prm = jnp.tile(prm_c, (B, 1))                     # (B*C, 3): row r -> channel r % C

    x2d = x_nchw.reshape(N, L)                        # free view (NCHW is contiguous)

    tn = _pick_tile(N, tile_n, 8)
    tl = _pick_tile(L, tile_l, 128)
    grid = (pl.cdiv(N, tn), pl.cdiv(L, tl))

    y2d = pl.pallas_call(
        _aconc_kernel,
        out_shape=jax.ShapeDtypeStruct((N, L), x_nchw.dtype),
        grid=grid,
        in_specs=[
            pl.BlockSpec((tn, tl), lambda i, j: (i, j)),
            pl.BlockSpec((tn, 3), lambda i, j: (i, 0)),
        ],
        out_specs=pl.BlockSpec((tn, tl), lambda i, j: (i, j)),
        compiler_params=pltpu.CompilerParams(
            dimension_semantics=("parallel", "parallel")),
    )(x2d, prm)

    return y2d.reshape(B, C, H, W)


# ----------------------------- main -----------------------------

if __name__ == "__main__":
    key = jax.random.PRNGKey(0)
    kx, k1, k2 = jax.random.split(key, 3)

    # Small shapes consistent with the module: AconC(c1) applied to an NCHW map.
    B, C, H, W = 2, 32, 16, 16
    x = jax.random.normal(kx, (B, C, H, W), jnp.float32)
    p1 = jax.random.normal(k1, (1, C, 1, 1), jnp.float32)    # nn.Parameter(torch.randn)
    p2 = jax.random.normal(k2, (1, C, 1, 1), jnp.float32)    # nn.Parameter(torch.randn)
    beta = jnp.ones((1, C, 1, 1), jnp.float32)               # nn.Parameter(torch.ones)

    fwd = jax.jit(aconc_forward)
    out = jax.block_until_ready(fwd(x, p1, p2, beta))

    # Pure-JAX reference of the PyTorch forward.
    dpx = (p1 - p2) * x
    ref = dpx * jax.nn.sigmoid(beta * dpx) + p2 * x

    assert out.shape == x.shape, out.shape
    assert bool(jnp.all(jnp.isfinite(out)))
    assert bool(jnp.allclose(out, ref, atol=1e-5, rtol=1e-5))
    print("KERNEL_OK")
</pallas_src>

<mosaic_0001>
module attributes {stable_mosaic.version = 11 : i64} {
  func.func @_aconc_kernel(%arg0: i32, %arg1: i32, %arg2: memref<64x256xf32, #tpu.memory_space<vmem>>, %arg3: memref<64x3xf32, #tpu.memory_space<vmem>>, %arg4: memref<64x256xf32, #tpu.memory_space<vmem>>) attributes {dimension_semantics = [#tpu.dimension_semantics<parallel>, #tpu.dimension_semantics<parallel>], iteration_bounds = array<i64: 1, 1>, scalar_prefetch = 0 : i64, scratch_operands = 0 : i64, tpu.core_type = #tpu.core_type<tc>, window_params = [{transform_indices = @transform_0, window_bounds = array<i64: 64, 256>}, {transform_indices = @transform_1, window_bounds = array<i64: 64, 3>}, {transform_indices = @transform_2, window_bounds = array<i64: 64, 256>}]} {
    %c0 = arith.constant 0 : index
    %c0_0 = arith.constant 0 : index
    %0 = vector.load %arg2[%c0, %c0_0] : memref<64x256xf32, #tpu.memory_space<vmem>>, vector<64x256xf32>
    %c0_1 = arith.constant 0 : index
    %c0_2 = arith.constant 0 : index
    %1 = vector.load %arg3[%c0_1, %c0_2] : memref<64x3xf32, #tpu.memory_space<vmem>>, vector<64x3xf32>
    %2 = vector.extract_strided_slice %1 {offsets = [0, 0], sizes = [64, 1], strides = [1, 1]} : vector<64x3xf32> to vector<64x1xf32>
    %3 = vector.extract_strided_slice %1 {offsets = [0, 1], sizes = [64, 1], strides = [1, 1]} : vector<64x3xf32> to vector<64x1xf32>
    %4 = vector.extract_strided_slice %1 {offsets = [0, 2], sizes = [64, 1], strides = [1, 1]} : vector<64x3xf32> to vector<64x1xf32>
    %5 = vector.broadcast %2 : vector<64x1xf32> to vector<64x256xf32>
    %6 = arith.mulf %5, %0 : vector<64x256xf32>
    %7 = vector.broadcast %4 : vector<64x1xf32> to vector<64x256xf32>
    %8 = arith.mulf %7, %6 : vector<64x256xf32>
    %9 = arith.negf %8 : vector<64x256xf32>
    %10 = math.exp %9 : vector<64x256xf32>
    %cst = arith.constant 1.000000e+00 : f32
    %11 = vector.broadcast %cst : f32 to vector<64x256xf32>
    %12 = arith.addf %11, %10 : vector<64x256xf32>
    %13 = arith.divf %11, %12 : vector<64x256xf32>
    %14 = arith.mulf %6, %13 : vector<64x256xf32>
    %15 = vector.broadcast %3 : vector<64x1xf32> to vector<64x256xf32>
    %16 = arith.mulf %15, %0 : vector<64x256xf32>
    %17 = arith.addf %14, %16 : vector<64x256xf32>
    %c0_3 = arith.constant 0 : index
    %c0_4 = arith.constant 0 : index
    %18 = vector.load %arg4[%c0_3, %c0_4] : memref<64x256xf32, #tpu.memory_space<vmem>>, vector<64x256xf32>
    tpu.vector_store %arg4[%c0_3, %c0_4], %17 {strides = array<i32>} : memref<64x256xf32, #tpu.memory_space<vmem>>, vector<64x256xf32>,
    return
  }
  func.func @transform_0(%arg0: i32, %arg1: i32) -> (i32, i32) {
    %c0_i32 = arith.constant 0 : i32
    return %arg0, %arg1 : i32, i32
  }
  func.func @transform_1(%arg0: i32, %arg1: i32) -> (i32, i32) {
    %c0_i32 = arith.constant 0 : i32
    %c0_i32_0 = arith.constant 0 : i32
    return %arg0, %c0_i32 : i32, i32
  }
  func.func @transform_2(%arg0: i32, %arg1: i32) -> (i32, i32) {
    %c0_i32 = arith.constant 0 : i32
    return %arg0, %arg1 : i32, i32
  }
}

</mosaic_0001>

<bundles_post_ra>
// kernel: aconc_forward.1
= control target key start
LH: loop header
LB: loop body
LE: loop exit
PB: predicated region body
PF: predicated region fallthrough
CT: control target
= control target key end

     0   :  { %v635_v0 = vmov 0   ;;  %v636_v9 = vmov 2   ;;  %v637_v10 = vmov 1   ;;  %s1135_s1 = inlined_call_operand.vmem [shape: f32[64,3], index: 1, kind: input, shape index: {}]   ;;  %s1136_s0 = inlined_call_operand.vmem [shape: f32[64,256], index: 0, kind: input, shape index: {}]   ;;  %s1137_s2 = inlined_call_operand.vmem [shape: f32[64,256], index: 2, kind: output, shape index: {}]  }
   0x1   :  { %564 = vset.pattern.permute.xlu2 %v635_v0  ;;  %563 = vset.pattern.permute.xlu1 %v635_v0  ;;  %v31_v1 = vld [vmem:[%s1135_s1 + $0x20] sm:$0xff]  ;;  %v29_v2 = vld [vmem:[%s1135_s1 + $0x10] sm:$0xff]  ;;  %v32_v4 = vld [vmem:[%s1135_s1 + $0x28] sm:$0xff] }
   0x2   :  { %v27_v3 = vld [vmem:[%s1135_s1] sm:$0xff]  ;;  %562 = vset.pattern.permute.xlu0 %v635_v0  ;;  %57 = vperm.xlu2 %564, %v31_v1   ;;  %v30_v5 = vld [vmem:[%s1135_s1 + $0x18] sm:$0xff]  ;;  %v28_v6 = vld [vmem:[%s1135_s1 + $0x8] sm:$0xff] }
   0x3   :  { %47 = vperm.xlu1 %563, %v29_v2   ;;  %37 = vperm.xlu0 %562, %v27_v3   ;;  %v34_v7 = vld [vmem:[%s1135_s1 + $0x38] sm:$0xff]  ;;  %v33_v8 = vld [vmem:[%s1135_s1 + $0x30] sm:$0xff]  ;;  %v680_v14 = vld [vmem:[%s1136_s0] sm:$0xff] }
   0x4   :  { %v685_v15 = vld [vmem:[%s1136_s0 + $0x8] sm:$0xff]  ;;  %v698_v23 = vld [vmem:[%s1136_s0 + $0x50] sm:$0xff]  ;;  %v708_v27 = vld [vmem:[%s1136_s0 + $0x38] sm:$0xff] }
   0x5   :  { %v703_v26 = vld [vmem:[%s1136_s0 + $0x30] sm:$0xff]  ;;  %v716_v31 = vld [vmem:[%s1136_s0 + $0x58] sm:$0xff]  ;;  %v743_v49 = vld [vmem:[%s1136_s0 + $0x40] sm:$0xff] }
   0x6   :  { %v748_v50 = vld [vmem:[%s1136_s0 + $0x48] sm:$0xff]  ;;  %v754_v51 = vld [vmem:[%s1136_s0 + $0x20] sm:$0xff]  ;;  %v764_v53 = vld [vmem:[%s1136_s0 + $0x10] sm:$0xff] }
   0x7   :  { %v759_v52 = vld [vmem:[%s1136_s0 + $0x28] sm:$0xff]  ;;  %v771_v56 = vld [vmem:[%s1136_s0 + $0x18] sm:$0xff] }
   0xa   :  { %62 = vperm.xlu2 %564, %v32_v4  }
   0xb   :  { %52 = vperm.xlu1 %563, %v30_v5   ;;  %42 = vperm.xlu0 %562, %v28_v6  }
  0x12   :  { %565 = vset.pattern.permute.xlu2 %v636_v9 }
  0x13   :  { %72 = vperm.xlu1 %563, %v34_v7   ;;  %67 = vperm.xlu0 %562, %v33_v8  }
  0x14   :  { %92 = vperm.xlu2 %565, %v27_v3  }
  0x1b   :  { %567 = vset.pattern.permute.xlu1 %v636_v9  ;;  %566 = vset.pattern.permute.xlu0 %v636_v9 }
  0x1c   :  { %100 = vperm.xlu1 %567, %v29_v2   ;;  %104 = vperm.xlu2 %565, %v30_v5  }
  0x1d   :  { %96 = vperm.xlu0 %566, %v28_v6  }
  0x24   :  { %108 = vperm.xlu1 %567, %v31_v1   ;;  %112 = vperm.xlu2 %565, %v32_v4  }
  0x25   :  { %116 = vperm.xlu0 %566, %v33_v8  }
  0x2c   :  { %120 = vperm.xlu1 %567, %v34_v7   ;;  %568 = vset.pattern.permute.xlu2 %v637_v10 }
  0x2d   :  { %460 = vperm.xlu2 %568, %v27_v3   ;;  %569 = vset.pattern.permute.xlu0 %v637_v10 }
  0x2e   :  { %464 = vperm.xlu0 %569, %v28_v6  }
  0x34   :  { %570 = vset.pattern.permute.xlu1 %v637_v10 }
  0x35   :  { %468 = vperm.xlu1 %570, %v29_v2   ;;  %472 = vperm.xlu2 %568, %v30_v5  }
  0x36   :  { %484 = vperm.xlu0 %569, %v33_v8  }
  0x3d   :  { %476 = vperm.xlu1 %570, %v31_v1   ;;  %480 = vperm.xlu2 %568, %v32_v4  }
  0x45   :  { %488 = vperm.xlu1 %570, %v34_v7  }
  0x5c   :  { %v58_v11 = vpop.permute.xlu2 %57 }
  0x5d   :  { %v774_v59 = vmul.f32 %v58_v11, %v743_v49  ;;  %v777_v60 = vmul.f32 %v58_v11, %v748_v50 }
  0x64   :  { %v63_v12 = vpop.permute.xlu2 %62 }
  0x65   :  { %v711_v28 = vmul.f32 %v63_v12, %v698_v23  ;;  %v728_v38 = vmul.f32 %v63_v12, %v716_v31 }
  0x6e   :  { %v93_v13 = vpop.permute.xlu2 %92 }
  0x75   :  { %v48_v16 = vpop.permute.xlu1 %47  ;;  %v38_v17 = vpop.permute.xlu0 %37 }
  0x76   :  { %v688_v18 = vmul.f32 %v38_v17, %v680_v14  ;;  %v691_v19 = vmul.f32 %v38_v17, %v685_v15  ;;  %v105_v20 = vpop.permute.xlu2 %104  ;;  %v782_v0 = vmul.f32 %v48_v16, %v754_v51  ;;  %v785_v1 = vmul.f32 %v48_v16, %v759_v52 }
  0x78   :  { %v123_v21 = vmul.f32 %v93_v13, %v688_v18  ;;  %v124_v22 = vmul.f32 %v93_v13, %v691_v19 }
  0x7a   :  { %v543_v24 = vmul.f32 -1.442695, %v123_v21  ;;  %v544_v25 = vmul.f32 -1.442695, %v124_v22 }
  0x7c   :  { %571 = vpow2.f32 %v543_v24 }
  0x7d   :  { %573 = vpow2.f32 %v544_v25  ;;  %v53_v29 = vpop.permute.xlu1 %52  ;;  %v43_v30 = vpop.permute.xlu0 %42 }
  0x7e   :  { %v719_v32 = vmul.f32 %v53_v29, %v703_v26  ;;  %v722_v33 = vmul.f32 %v53_v29, %v708_v27  ;;  %v113_v34 = vpop.permute.xlu2 %112  ;;  %v788_v2 = vmul.f32 %v43_v30, %v764_v53  ;;  %v797_v6 = vmul.f32 %v43_v30, %v771_v56 }
  0x7f   :  { %v133_v35 = vmul.f32 %v113_v34, %v711_v28  ;;  %v134_v46 = vmul.f32 %v113_v34, %v728_v38 }
  0x80   :  { %v129_v36 = vmul.f32 %v105_v20, %v719_v32  ;;  %v130_v37 = vmul.f32 %v105_v20, %v722_v33 }
  0x81   :  { %v553_v39 = vmul.f32 -1.442695, %v133_v35  ;;  %v554_v57 = vmul.f32 -1.442695, %v134_v46 }
  0x82   :  { %v572_v40 = vpop.eup %571  ;;  %v549_v41 = vmul.f32 -1.442695, %v129_v36  ;;  %v550_v44 = vmul.f32 -1.442695, %v130_v37 }
  0x83   :  { %v574_v42 = vpop.eup %573  ;;  %v730_v43 = vadd.f32 1.0, %v572_v40  ;;  %575 = vpow2.f32 %v553_v39 }
  0x84   :  { %v732_v45 = vadd.f32 1.0, %v574_v42  ;;  %577 = vpow2.f32 %v549_v41 }
  0x85   :  { %579 = vrcp.f32 %v730_v43  ;;  %v736_v47 = vpop.permute.xlu1 %72  ;;  %v738_v48 = vpop.permute.xlu0 %67  ;;  %v212_v54 = vand.u32 2147483647, %v730_v43  ;;  %v214_v55 = vand.u32 2147483648, %v730_v43  ;;  %vm208_vm0 = vweird.f32 %v730_v43 }
  0x86   :  { %581 = vrcp.f32 %v732_v45  ;;  %v227_v61 = vand.u32 2147483647, %v732_v45  ;;  %v229_v62 = vand.u32 2147483648, %v732_v45  ;;  %vm223_vm1 = vweird.f32 %v732_v45 }
  0x87   :  { %583 = vpow2.f32 %v550_v44  ;;  %vm800_vm2 = vcmp.eq.f32.partialorder %v212_v54, 8.507059e+37  ;;  %v215_v10 = vor.u32 1.1754944e-38, %v214_v55  ;;  %v461_v11 = vpop.permute.xlu2 %460 }
  0x88   :  { %585 = vpow2.f32 %v554_v57  ;;  %vm805_vm3 = vcmp.eq.f32.partialorder %v227_v61, 8.507059e+37  ;;  %v230_v17 = vor.u32 1.1754944e-38, %v229_v62  ;;  %v491_v20 = vmul.f32 %v461_v11, %v680_v14 }
  0x89   :  { %v576_v58 = vpop.eup %575  ;;  %v492_v24 = vmul.f32 %v461_v11, %v685_v15 }
  0x8a   :  { %v578_v63 = vpop.eup %577  ;;  %v790_v3 = vadd.f32 1.0, %v576_v58 }
  0x8b   :  { %v580_v4 = vpop.eup %579  ;;  %v794_v5 = vadd.f32 1.0, %v578_v63 }
  0x8c   :  { %v582_v7 = vpop.eup %581  ;;  %v204_v8 = vmul.f32 %v580_v4, %v730_v43  ;;  %vm209_vm4 = vweird.f32 %v580_v4  ;;  %v362_v40 = vand.u32 2147483647, %v790_v3  ;;  %vm358_vm14 = vweird.f32 %v790_v3 }
  0x8d   :  { %v584_v12 = vpop.eup %583  ;;  %v219_v13 = vmul.f32 %v582_v7, %v732_v45  ;;  %587 = vrcp.f32 %v794_v5  ;;  %v304_v30 = vand.u32 2147483648, %v794_v5  ;;  %v302_v14 = vand.u32 2147483647, %v794_v5  ;;  %vm210_vm7 = vmor %vm208_vm0, %vm209_vm4 }
  0x8e   :  { %v205_v21 = vsub.f32 1.0, %v204_v8  ;;  %v811_v22 = vadd.f32 1.0, %v584_v12  ;;  %v101_v25 = vpop.permute.xlu1 %100  ;;  %589 = vrcp.f32 %v790_v3  ;;  %vm224_vm5 = vweird.f32 %v582_v7  ;;  %v586_v41 = vpop.eup %585 }
  0x8f   :  { %v220_v29 = vsub.f32 1.0, %v219_v13  ;;  %v127_v34 = vmul.f32 %v101_v25, %v782_v0  ;;  %v128_v35 = vmul.f32 %v101_v25, %v785_v1  ;;  %v97_v36 = vpop.permute.xlu0 %96  ;;  %vm298_vm6 = vweird.f32 %v794_v5  ;;  %vm225_vm8 = vmor %vm223_vm1, %vm224_vm5 }
  0x90   :  { %v206_v37 = vmul.f32 %v580_v4, %v205_v21  ;;  %591 = vrcp.f32 %v811_v22  ;;  %v319_v15 = vand.u32 2147483648, %v811_v22  ;;  %v125_v54 = vmul.f32 %v97_v36, %v788_v2 }
  0x91   :  { %v221_v39 = vmul.f32 %v582_v7, %v220_v29  ;;  %v547_v44 = vmul.f32 -1.442695, %v127_v34  ;;  %v548_v46 = vmul.f32 -1.442695, %v128_v35  ;;  %v305_v58 = vor.u32 1.1754944e-38, %v304_v30  ;;  %v473_v35 = vpop.permute.xlu2 %472 }
  0x92   :  { %v207_v42 = vadd.f32 %v580_v4, %v206_v37  ;;  %v317_v61 = vand.u32 2147483647, %v811_v22  ;;  %v126_v62 = vmul.f32 %v97_v36, %v797_v6  ;;  %vm834_vm9 = vcmp.eq.f32.partialorder %v302_v14, 8.507059e+37 }
  0x93   :  { %v588_v55 = vpop.eup %587  ;;  %v222_v57 = vadd.f32 %v582_v7, %v221_v39  ;;  %v320_v43 = vor.u32 1.1754944e-38, %v319_v15  ;;  %593 = vpow2.f32 %v547_v44  ;;  %vm313_vm10 = vweird.f32 %v811_v22 }
  0x94   :  { %v828_v63 = vpop.eup %589  ;;  %v211_v8 = vsel %vm210_vm7, %v580_v4, %v207_v42  ;;  %v294_v11 = vmul.f32 %v588_v55, %v794_v5  ;;  %595 = vpow2.f32 %v548_v46  ;;  %v545_v4 = vmul.f32 -1.442695, %v125_v54 }
  0x95   :  { %v216_v13 = vsel %vm800_vm2, %v215_v10, %v211_v8  ;;  %v226_v21 = vsel %vm225_vm8, %v582_v7, %v222_v57  ;;  %v546_v34 = vmul.f32 -1.442695, %v126_v62  ;;  %vm299_vm11 = vweird.f32 %v588_v55 }
  0x96   :  { %v592_v25 = vpop.eup %591  ;;  %v231_v45 = vsel %vm805_vm3, %v230_v17, %v226_v21  ;;  %v443_v29 = vmul.f32 %v216_v13, %v688_v18  ;;  %v295_v30 = vsub.f32 1.0, %v294_v11  ;;  %v109_v36 = vpop.permute.xlu1 %108  ;;  %vm846_vm12 = vcmp.eq.f32.partialorder %v317_v61, 8.507059e+37  ;;  %vm300_vm15 = vmor %vm298_vm6, %vm299_vm11 }
  0x97   :  { %v444_v37 = vmul.f32 %v231_v45, %v691_v19  ;;  %v309_v9 = vmul.f32 %v592_v25, %v811_v22  ;;  %597 = vpow2.f32 %v545_v4  ;;  %vm314_vm13 = vweird.f32 %v592_v25 }
  0x98   :  { %v296_v10 = vmul.f32 %v588_v55, %v295_v30  ;;  %v507_v16 = vadd.f32 %v491_v20, %v443_v29  ;;  %599 = vpow2.f32 %v546_v34  ;;  %v497_v14 = vmul.f32 %v473_v35, %v703_v26  ;;  %vm315_vm1 = vmor %vm313_vm10, %vm314_vm13 }
  0x99   :  { %v310_v18 = vsub.f32 1.0, %v309_v9  ;;  %v508_v17 = vadd.f32 %v492_v24, %v444_v37  ;;  %v131_v19 = vmul.f32 %v109_v36, %v774_v59  ;;  %v594_v39 = vpop.eup %593  ;;  %v498_v42 = vmul.f32 %v473_v35, %v708_v27  ;;  %v481_v30 = vpop.permute.xlu2 %480 }
  0x9a   :  { %v297_v15 = vadd.f32 %v588_v55, %v296_v10  ;;  %523 = vst [vmem:[%s1137_s2] sm:$0xff] %v507_v16  ;;  %v132_v44 = vmul.f32 %v109_v36, %v777_v60  ;;  %v354_v20 = vmul.f32 %v828_v63, %v790_v3  ;;  %v596_v46 = vpop.eup %595  ;;  %v866_v24 = vadd.f32 1.0, %v594_v39 }
  0x9b   :  { %v311_v26 = vmul.f32 %v592_v25, %v310_v18  ;;  %524 = vst [vmem:[%s1137_s2 + $0x8] sm:$0xff] %v508_v17  ;;  %v551_v54 = vmul.f32 -1.442695, %v131_v19  ;;  %v868_v57 = vadd.f32 1.0, %v586_v41  ;;  %v870_v61 = vadd.f32 1.0, %v596_v46 }
  0x9c   :  { %v301_v27 = vsel %vm300_vm15, %v588_v55, %v297_v15  ;;  %v355_v62 = vsub.f32 1.0, %v354_v20  ;;  %vm359_vm0 = vweird.f32 %v828_v63  ;;  %601 = vrcp.f32 %v866_v24 }
  0x9d   :  { %v598_v8 = vpop.eup %597  ;;  %v306_v5 = vsel %vm834_vm9, %v305_v58, %v301_v27  ;;  %v312_v11 = vadd.f32 %v592_v25, %v311_v26  ;;  %v552_v13 = vmul.f32 -1.442695, %v132_v44  ;;  %603 = vrcp.f32 %v870_v61  ;;  %vm360_vm2 = vmor %vm358_vm14, %vm359_vm0 }
  0x9e   :  { %v600_v21 = vpop.eup %599  ;;  %v449_v41 = vmul.f32 %v306_v5, %v719_v32  ;;  %v881_v55 = vadd.f32 1.0, %v598_v8  ;;  %v356_v4 = vmul.f32 %v828_v63, %v355_v62  ;;  %605 = vpow2.f32 %v551_v54  ;;  %v897_v35 = vpop.permute.xlu1 %120 }
  0x9f   :  { %v316_v45 = vsel %vm315_vm1, %v592_v25, %v312_v11  ;;  %v884_v12 = vadd.f32 1.0, %v600_v21  ;;  %v364_v58 = vand.u32 2147483648, %v790_v3  ;;  %vm363_vm3 = vcmp.eq.f32.partialorder %v362_v40, 8.507059e+37  ;;  %v945_v11 = vpop.permute.xlu0 %116 }
  0xa0   :  { %v321_v29 = vsel %vm846_vm12, %v320_v43, %v316_v45  ;;  %607 = vrcp.f32 %v881_v55  ;;  %v513_v22 = vadd.f32 %v497_v14, %v449_v41  ;;  %v357_v32 = vadd.f32 %v828_v63, %v356_v4 }
  0xa1   :  { %v450_v34 = vmul.f32 %v321_v29, %v722_v33  ;;  %609 = vrcp.f32 %v884_v12  ;;  %v365_v25 = vor.u32 1.1754944e-38, %v364_v58  ;;  %v379_v33 = vand.u32 2147483648, %v868_v57 }
  0xa2   :  { %529 = vst [vmem:[%s1137_s2 + $0x30] sm:$0xff] %v513_v22  ;;  %611 = vpow2.f32 %v552_v13  ;;  %v361_v43 = vsel %vm360_vm2, %v828_v63, %v357_v32  ;;  %v602_v36 = vpop.eup %601  ;;  %v501_v7 = vmul.f32 %v481_v30, %v698_v23  ;;  %v377_v18 = vand.u32 2147483647, %v868_v57 }
  0xa3   :  { %v514_v37 = vadd.f32 %v498_v42, %v450_v34  ;;  %v366_v9 = vsel %vm363_vm3, %v365_v25, %v361_v43  ;;  %613 = vrcp.f32 %v868_v57  ;;  %v604_v10 = vpop.eup %603  ;;  %v264_v16 = vmul.f32 %v602_v36, %v866_v24 }
  0xa4   :  { %v453_v17 = vmul.f32 %v366_v9, %v711_v28  ;;  %v606_v63 = vpop.eup %605  ;;  %v279_v3 = vmul.f32 %v604_v10, %v870_v61  ;;  %v915_v40 = vor.u32 1.1754944e-38, %v379_v33  ;;  %v918_v14 = vmul.f32 %v481_v30, %v716_v31 }
  0xa5   :  { %530 = vst [vmem:[%s1137_s2 + $0x38] sm:$0xff] %v514_v37  ;;  %vm268_vm4 = vweird.f32 %v866_v24  ;;  %v923_v19 = vadd.f32 1.0, %v606_v63  ;;  %v265_v28 = vsub.f32 1.0, %v264_v16  ;;  %v272_v15 = vand.u32 2147483647, %v866_v24 }
  0xa6   :  { %v921_v23 = vpop.eup %607  ;;  %v517_v39 = vadd.f32 %v501_v7, %v453_v17  ;;  %vm269_vm5 = vweird.f32 %v602_v36  ;;  %v274_v20 = vand.u32 2147483648, %v866_v24  ;;  %v280_v31 = vsub.f32 1.0, %v279_v3 }
  0xa7   :  { %v926_v42 = vpop.eup %609  ;;  %v234_v44 = vmul.f32 %v921_v23, %v881_v55  ;;  %615 = vrcp.f32 %v923_v19  ;;  %vm373_vm6 = vweird.f32 %v868_v57  ;;  %v266_v54 = vmul.f32 %v602_v36, %v265_v28  ;;  %v469_v58 = vpop.permute.xlu1 %468  ;;  %vm270_vm12 = vmor %vm268_vm4, %vm269_vm5 }
  0xa8   :  { %v612_v46 = vpop.eup %611  ;;  %v249_v26 = vmul.f32 %v926_v42, %v884_v12  ;;  %533 = vst [vmem:[%s1137_s2 + $0x50] sm:$0xff] %v517_v39  ;;  %vm283_vm7 = vweird.f32 %v870_v61  ;;  %vm941_vm8 = vcmp.eq.f32.partialorder %v272_v15, 8.507059e+37  ;;  %v281_v5 = vmul.f32 %v604_v10, %v280_v31 }
  0xa9   :  { %v614_v27 = vpop.eup %613  ;;  %v939_v62 = vadd.f32 1.0, %v612_v46  ;;  %vm284_vm9 = vweird.f32 %v604_v10  ;;  %vm948_vm10 = vcmp.eq.f32.partialorder %v377_v18, 8.507059e+37  ;;  %v267_v41 = vadd.f32 %v602_v36, %v266_v54 }
  0xaa   :  { %v369_v13 = vmul.f32 %v614_v27, %v868_v57  ;;  %v275_v4 = vor.u32 1.1754944e-38, %v274_v20  ;;  %v287_v45 = vand.u32 2147483647, %v870_v61  ;;  %vm374_vm11 = vweird.f32 %v614_v27  ;;  %vm285_vm13 = vmor %vm283_vm7, %vm284_vm9 }
  0xab   :  { %617 = vrcp.f32 %v939_v62  ;;  %v282_v29 = vadd.f32 %v604_v10, %v281_v5  ;;  %v289_v22 = vand.u32 2147483648, %v870_v61  ;;  %v271_v32 = vsel %vm270_vm12, %v602_v36, %v267_v41  ;;  %vm375_vm1 = vmor %vm373_vm6, %vm374_vm11  ;;  %v1014_v41 = vld [vmem:[%s1136_s0 + $0x60] sm:$0xff] }
  0xac   :  { %v370_v30 = vsub.f32 1.0, %v369_v13  ;;  %vm288_vm14 = vcmp.eq.f32.partialorder %v287_v45, 8.507059e+37  ;;  %v495_v34 = vmul.f32 %v469_v58, %v754_v51  ;;  %v276_v25 = vsel %vm941_vm8, %v275_v4, %v271_v32 }
  0xad   :  { %v286_v43 = vsel %vm285_vm13, %v604_v10, %v282_v29  ;;  %v290_v33 = vor.u32 1.1754944e-38, %v289_v22  ;;  %v235_v37 = vsub.f32 1.0, %v234_v44  ;;  %v964_v24 = vpop.eup %615  ;;  %v447_v7 = vmul.f32 %v276_v25, %v782_v0 }
  0xae   :  { %v371_v9 = vmul.f32 %v614_v27, %v370_v30  ;;  %v496_v36 = vmul.f32 %v469_v58, %v759_v52  ;;  %vm238_vm15 = vweird.f32 %v881_v55  ;;  %vm239_vm0 = vweird.f32 %v921_v23 }
  0xaf   :  { %v291_v61 = vsel %vm288_vm14, %v290_v33, %v286_v43  ;;  %v236_v16 = vmul.f32 %v921_v23, %v235_v37  ;;  %v242_v51 = vand.u32 2147483647, %v881_v55  ;;  %v511_v17 = vadd.f32 %v495_v34, %v447_v7  ;;  %vm240_vm3 = vmor %vm238_vm15, %vm239_vm0  ;;  %v477_v30 = vpop.permute.xlu1 %476  ;;  %v1056_v37 = vld [vmem:[%s1136_s0 + $0x70] sm:$0xff] }
  0xb0   :  { %v372_v18 = vadd.f32 %v614_v27, %v371_v9  ;;  %v448_v10 = vmul.f32 %v291_v61, %v785_v1  ;;  %v244_v63 = vand.u32 2147483648, %v881_v55  ;;  %v324_v52 = vmul.f32 %v964_v24, %v923_v19  ;;  %v465_v1 = vpop.permute.xlu0 %464  ;;  %v1061_v9 = vld [vmem:[%s1136_s0 + $0x78] sm:$0xff] }
  0xb1   :  { %v974_v3 = vpop.eup %617  ;;  %v237_v0 = vadd.f32 %v921_v23, %v236_v16  ;;  %vm243_vm2 = vcmp.eq.f32.partialorder %v242_v51, 8.507059e+37  ;;  %v250_v39 = vsub.f32 1.0, %v249_v26  ;;  %527 = vst [vmem:[%s1137_s2 + $0x20] sm:$0xff] %v511_v17  ;;  %vm253_vm4 = vweird.f32 %v884_v12 }
  0xb2   :  { %v376_v28 = vsel %vm375_vm1, %v614_v27, %v372_v18  ;;  %v512_v15 = vadd.f32 %v496_v36, %v448_v10  ;;  %v245_v44 = vor.u32 1.1754944e-38, %v244_v63  ;;  %vm254_vm5 = vweird.f32 %v926_v42 }
  0xb3   :  { %v381_v57 = vsel %vm948_vm10, %v915_v40, %v376_v28  ;;  %v241_v20 = vsel %vm240_vm3, %v921_v23, %v237_v0  ;;  %v251_v31 = vmul.f32 %v926_v42, %v250_v39  ;;  %v257_v26 = vand.u32 2147483647, %v884_v12  ;;  %vm255_vm6 = vmor %vm253_vm4, %vm254_vm5 }
  0xb4   :  { %v454_v46 = vmul.f32 %v381_v57, %v728_v38  ;;  %528 = vst [vmem:[%s1137_s2 + $0x28] sm:$0xff] %v512_v15  ;;  %v246_v55 = vsel %vm243_vm2, %v245_v44, %v241_v20  ;;  %v259_v54 = vand.u32 2147483648, %v884_v12  ;;  %v339_v40 = vmul.f32 %v974_v3, %v939_v62 }
  0xb5   :  { %v252_v23 = vadd.f32 %v926_v42, %v251_v31  ;;  %v445_v27 = vmul.f32 %v246_v55, %v788_v2  ;;  %v493_v8 = vmul.f32 %v465_v1, %v764_v53  ;;  %v494_v13 = vmul.f32 %v465_v1, %v771_v56  ;;  %v1019_v2 = vld [vmem:[%s1136_s0 + $0x68] sm:$0xff] }
  0xb6   :  { %v518_v38 = vadd.f32 %v918_v14, %v454_v46  ;;  %v260_v5 = vor.u32 1.1754944e-38, %v259_v54  ;;  %v325_v21 = vsub.f32 1.0, %v324_v52  ;;  %vm258_vm7 = vcmp.eq.f32.partialorder %v257_v26, 8.507059e+37 }
  0xb7   :  { %v256_v53 = vsel %vm255_vm6, %v926_v42, %v252_v23  ;;  %v509_v14 = vadd.f32 %v493_v8, %v445_v27  ;;  %vm329_vm8 = vweird.f32 %v964_v24  ;;  %v332_v4 = vand.u32 2147483647, %v923_v19 }
  0xb8   :  { %534 = vst [vmem:[%s1137_s2 + $0x58] sm:$0xff] %v518_v38  ;;  %v261_v56 = vsel %vm258_vm7, %v260_v5, %v256_v53  ;;  %v326_v12 = vmul.f32 %v964_v24, %v325_v21  ;;  %v334_v45 = vand.u32 2147483648, %v923_v19  ;;  %v340_v42 = vsub.f32 1.0, %v339_v40  ;;  %v485_v55 = vpop.permute.xlu0 %484 }
  0xb9   :  { %v446_v58 = vmul.f32 %v261_v56, %v797_v6  ;;  %525 = vst [vmem:[%s1137_s2 + $0x10] sm:$0xff] %v509_v14  ;;  %v1035_v29 = vmul.f32 %v738_v48, %v1014_v41  ;;  %v1039_v22 = vmul.f32 %v738_v48, %v1019_v2  ;;  %vm328_vm9 = vweird.f32 %v923_v19 }
  0xba   :  { %v327_v32 = vadd.f32 %v964_v24, %v326_v12  ;;  %vm344_vm10 = vweird.f32 %v974_v3  ;;  %v347_v6 = vand.u32 2147483647, %v939_v62  ;;  %vm330_vm11 = vmor %vm328_vm9, %vm329_vm8  ;;  %v335_v25 = vor.u32 1.1754944e-38, %v334_v45 }
  0xbb   :  { %v510_v34 = vadd.f32 %v494_v13, %v446_v58  ;;  %v341_v43 = vmul.f32 %v974_v3, %v340_v42  ;;  %v349_v33 = vand.u32 2147483648, %v939_v62  ;;  %vm333_vm12 = vcmp.eq.f32.partialorder %v332_v4, 8.507059e+37 }
  0xbc   :  { %v331_v48 = vsel %vm330_vm11, %v964_v24, %v327_v32  ;;  %vm343_vm13 = vweird.f32 %v939_v62  ;;  %v135_v19 = vmul.f32 %v945_v11, %v1035_v29  ;;  %v499_v7 = vmul.f32 %v477_v30, %v743_v49 }
  0xbd   :  { %526 = vst [vmem:[%s1137_s2 + $0x18] sm:$0xff] %v510_v34  ;;  %v336_v24 = vsel %vm333_vm12, %v335_v25, %v331_v48  ;;  %v342_v62 = vadd.f32 %v974_v3, %v341_v43  ;;  %v136_v36 = vmul.f32 %v945_v11, %v1039_v22  ;;  %vm345_vm14 = vmor %vm343_vm13, %vm344_vm10  ;;  %vm348_vm15 = vcmp.eq.f32.partialorder %v347_v6, 8.507059e+37 }
  0xbe   :  { %v350_v61 = vor.u32 1.1754944e-38, %v349_v33  ;;  %v451_v16 = vmul.f32 %v336_v24, %v774_v59  ;;  %v555_v51 = vmul.f32 -1.442695, %v135_v19  ;;  %v1076_v17 = vmul.f32 %v736_v47, %v1056_v37 }
  0xbf   :  { %v346_v18 = vsel %vm345_vm14, %v974_v3, %v342_v62  ;;  %v556_v10 = vmul.f32 -1.442695, %v136_v36  ;;  %v1080_v49 = vmul.f32 %v736_v47, %v1061_v9  ;;  %v500_v63 = vmul.f32 %v477_v30, %v748_v50 }
  0xc0   :  { %v351_v11 = vsel %vm348_vm15, %v350_v61, %v346_v18  ;;  %v515_v52 = vadd.f32 %v499_v7, %v451_v16  ;;  %619 = vpow2.f32 %v555_v51  ;;  %v137_v59 = vmul.f32 %v897_v35, %v1076_v17 }
  0xc1   :  { %v452_v0 = vmul.f32 %v351_v11, %v777_v60  ;;  %621 = vpow2.f32 %v556_v10  ;;  %v138_v3 = vmul.f32 %v897_v35, %v1080_v49  ;;  %v503_v13 = vmul.f32 %v485_v55, %v1014_v41  ;;  %v489_v11 = vpop.permute.xlu1 %488 }
  0xc2   :  { %531 = vst [vmem:[%s1137_s2 + $0x40] sm:$0xff] %v515_v52  ;;  %v557_v39 = vmul.f32 -1.442695, %v137_v59  ;;  %v504_v21 = vmul.f32 %v485_v55, %v1019_v2 }
  0xc3   :  { %v516_v47 = vadd.f32 %v500_v63, %v452_v0  ;;  %v558_v28 = vmul.f32 -1.442695, %v138_v3 }
  0xc4   :  { %623 = vpow2.f32 %v557_v39 }
  0xc5   :  { %532 = vst [vmem:[%s1137_s2 + $0x48] sm:$0xff] %v516_v47  ;;  %625 = vpow2.f32 %v558_v28  ;;  %v505_v28 = vmul.f32 %v489_v11, %v1056_v37 }
  0xc6   :  { %v620_v50 = vpop.eup %619 }
  0xc7   :  { %v622_v60 = vpop.eup %621  ;;  %v199_v15 = vadd.f32 1.0, %v620_v50 }
  0xc8   :  { %v200_v1 = vadd.f32 1.0, %v622_v60  ;;  %v506_v60 = vmul.f32 %v489_v11, %v1061_v9 }
  0xc9   :  { %627 = vrcp.f32 %v199_v15  ;;  %v392_v54 = vand.u32 2147483647, %v199_v15  ;;  %v394_v40 = vand.u32 2147483648, %v199_v15  ;;  %vm388_vm0 = vweird.f32 %v199_v15 }
  0xca   :  { %629 = vrcp.f32 %v200_v1  ;;  %v624_v35 = vpop.eup %623  ;;  %v407_v8 = vand.u32 2147483647, %v200_v1  ;;  %v409_v38 = vand.u32 2147483648, %v200_v1  ;;  %vm403_vm3 = vweird.f32 %v200_v1 }
  0xcb   :  { %v626_v44 = vpop.eup %625  ;;  %v201_v57 = vadd.f32 1.0, %v624_v35  ;;  %vm1099_vm2 = vcmp.eq.f32.partialorder %v392_v54, 8.507059e+37  ;;  %v395_v4 = vor.u32 1.1754944e-38, %v394_v40 }
  0xcc   :  { %v1094_v20 = vadd.f32 1.0, %v626_v44  ;;  %vm1103_vm5 = vcmp.eq.f32.partialorder %v407_v8, 8.507059e+37  ;;  %v410_v41 = vor.u32 1.1754944e-38, %v409_v38 }
  0xcd   :  { %631 = vrcp.f32 %v201_v57  ;;  %v422_v34 = vand.u32 2147483647, %v201_v57  ;;  %v424_v25 = vand.u32 2147483648, %v201_v57  ;;  %vm418_vm10 = vweird.f32 %v201_v57 }
  0xce   :  { %633 = vrcp.f32 %v1094_v20  ;;  %v437_v48 = vand.u32 2147483647, %v1094_v20  ;;  %v439_v19 = vand.u32 2147483648, %v1094_v20  ;;  %vm433_vm12 = vweird.f32 %v1094_v20 }
  0xcf   :  { %v628_v31 = vpop.eup %627  ;;  %v425_v63 = vor.u32 1.1754944e-38, %v424_v25  ;;  %vm423_vm13 = vcmp.eq.f32.partialorder %v422_v34, 8.507059e+37 }
  0xd0   :  { %v630_v46 = vpop.eup %629  ;;  %v384_v26 = vmul.f32 %v628_v31, %v199_v15  ;;  %vm389_vm1 = vweird.f32 %v628_v31  ;;  %v440_v3 = vor.u32 1.1754944e-38, %v439_v19  ;;  %vm438_vm15 = vcmp.eq.f32.partialorder %v437_v48, 8.507059e+37 }
  0xd1   :  { %v399_v23 = vmul.f32 %v630_v46, %v200_v1  ;;  %vm404_vm4 = vweird.f32 %v630_v46  ;;  %vm390_vm6 = vmor %vm388_vm0, %vm389_vm1 }
  0xd2   :  { %v385_v27 = vsub.f32 1.0, %v384_v26  ;;  %vm405_vm7 = vmor %vm403_vm3, %vm404_vm4 }
  0xd3   :  { %v400_v5 = vsub.f32 1.0, %v399_v23  ;;  %v632_v53 = vpop.eup %631 }
  0xd4   :  { %v386_v14 = vmul.f32 %v628_v31, %v385_v27  ;;  %v634_v12 = vpop.eup %633  ;;  %v414_v58 = vmul.f32 %v632_v53, %v201_v57  ;;  %vm419_vm8 = vweird.f32 %v632_v53 }
  0xd5   :  { %v401_v45 = vmul.f32 %v630_v46, %v400_v5  ;;  %v429_v2 = vmul.f32 %v634_v12, %v1094_v20  ;;  %vm434_vm9 = vweird.f32 %v634_v12  ;;  %vm420_vm11 = vmor %vm418_vm10, %vm419_vm8 }
  0xd6   :  { %v387_v42 = vadd.f32 %v628_v31, %v386_v14  ;;  %v415_v6 = vsub.f32 1.0, %v414_v58  ;;  %vm435_vm14 = vmor %vm433_vm12, %vm434_vm9 }
  0xd7   :  { %v402_v32 = vadd.f32 %v630_v46, %v401_v45  ;;  %v430_v33 = vsub.f32 1.0, %v429_v2 }
  0xd8   :  { %v391_v43 = vsel %vm390_vm6, %v628_v31, %v387_v42  ;;  %v416_v7 = vmul.f32 %v632_v53, %v415_v6 }
  0xd9   :  { %v396_v24 = vsel %vm1099_vm2, %v395_v4, %v391_v43  ;;  %v406_v62 = vsel %vm405_vm7, %v630_v46, %v402_v32  ;;  %v431_v16 = vmul.f32 %v634_v12, %v430_v33 }
  0xda   :  { %v411_v36 = vsel %vm1103_vm5, %v410_v41, %v406_v62  ;;  %v455_v61 = vmul.f32 %v396_v24, %v1035_v29  ;;  %v417_v18 = vadd.f32 %v632_v53, %v416_v7 }
  0xdb   :  { %v456_v51 = vmul.f32 %v411_v36, %v1039_v22  ;;  %v432_v52 = vadd.f32 %v634_v12, %v431_v16 }
  0xdc   :  { %v519_v10 = vadd.f32 %v503_v13, %v455_v61  ;;  %v421_v59 = vsel %vm420_vm11, %v632_v53, %v417_v18 }
  0xdd   :  { %v520_v0 = vadd.f32 %v504_v21, %v456_v51  ;;  %v426_v29 = vsel %vm423_vm13, %v425_v63, %v421_v59  ;;  %v436_v22 = vsel %vm435_vm14, %v634_v12, %v432_v52 }
  0xde   :  { %535 = vst [vmem:[%s1137_s2 + $0x60] sm:$0xff] %v519_v10  ;;  %v441_v47 = vsel %vm438_vm15, %v440_v3, %v436_v22  ;;  %v457_v39 = vmul.f32 %v426_v29, %v1076_v17 }
  0xdf   :  { %536 = vst [vmem:[%s1137_s2 + $0x68] sm:$0xff] %v520_v0  ;;  %v458_v50 = vmul.f32 %v441_v47, %v1080_v49 }
  0xe0   :  { %v521_v15 = vadd.f32 %v505_v28, %v457_v39 }
  0xe1   :  { %v522_v1 = vadd.f32 %v506_v60, %v458_v50 }
  0xe2   :  { %537 = vst [vmem:[%s1137_s2 + $0x70] sm:$0xff] %v521_v15 }
  0xe3   :  { %538 = vst [vmem:[%s1137_s2 + $0x78] sm:$0xff] %v522_v1 }

</bundles_post_ra>
